<compile_context>
chip_gen: v5e
topology: v5e:2x2
jax: 0.10.0
libtpu: 0.0.40
codegen_flags: <defaults>
</compile_context>

<pallas_src>
import jax
import jax.numpy as jnp
from jax.experimental import pallas as pl
from jax.experimental.pallas import tpu as pltpu


def _round_up(x, m):
    return -(-x // m) * m


def cbr_forward(x, weight, bias, *, stride=2, padding=2,
                compute_dtype=jnp.bfloat16, out_dtype=jnp.float32):
    """Conv2d(stride, padding) + ReLU.  x: (N,Cin,H,W) NCHW; weight: (Cout,Cin,KH,KW)."""
    N, C_in, H, W = x.shape
    C_out, _, KH, KW = weight.shape
    s = stride
    Ho = (H + 2 * padding - KH) // s + 1
    Wo = (W + 2 * padding - KW) // s + 1

    Hp, Wp = H + 2 * padding, W + 2 * padding
    Hph, Wph = -(-Hp // s), -(-Wp // s)          # stride-phase image size
    M = Hph * Wph                                # flattened per-image phase grid
    n_phase = s * s

    C_in_p = _round_up(C_in, 8)
    C_out_p = _round_up(C_out, 8)

    # Lane tile over the flattened per-image spatial axis (multiple of 128).
    TM = min(1024, _round_up(M, 128))
    n_tiles = -(-M // TM)
    M_out = n_tiles * TM
    s_max = ((KH - 1) // s) * Wph + (KW - 1) // s      # max tap lane-shift
    Lin = _round_up(M_out + s_max, 128)                # input lanes incl. halo

    # ---- wrapper glue: pad + stride-phase split (one cheap pass, no 9x blowup) ----
    xp = jnp.pad(x, ((0, 0), (0, 0),
                     (padding, padding + s * Hph - Hp),
                     (padding, padding + s * Wph - Wp)))
    xp = xp.reshape(N, C_in, Hph, s, Wph, s).transpose(0, 3, 5, 1, 2, 4)
    xp = xp.reshape(N, n_phase, C_in, M)
    xp = jnp.pad(xp, ((0, 0), (0, 0), (0, C_in_p - C_in), (0, Lin - M)))
    xp = xp.astype(compute_dtype)

    # Per-tap weights (KH*KW, C_out_p, C_in_p); padded rows/cols are zeros.
    w_taps = weight.transpose(2, 3, 0, 1).reshape(KH * KW, C_out, C_in)
    w_taps = jnp.pad(w_taps, ((0, 0), (0, C_out_p - C_out), (0, C_in_p - C_in)))
    w_taps = w_taps.astype(compute_dtype)
    b_col = jnp.pad(bias, (0, C_out_p - C_out)).reshape(C_out_p, 1).astype(jnp.float32)

    def kernel(w_ref, b_ref, x_ref, o_ref):
        # w_ref: (KH*KW, C_out_p, C_in_p) bf16   b_ref: (C_out_p, 1) f32
        # x_ref: (1, n_phase, C_in_p, Lin) bf16  o_ref: (1, C_out_p, TM)
        if n_tiles == 1:
            base = 0                                          # fully static offsets
        else:
            base = pl.multiple_of(pl.program_id(1) * TM, 128)
        acc = jnp.zeros((C_out_p, TM), jnp.float32)
        for k in range(KH * KW):                              # unrolled tap loop
            kh, kw = divmod(k, KW)
            p = (kh % s) * s + (kw % s)                       # which stride phase
            shift = (kh // s) * Wph + (kw // s)               # lane shift of that tap
            x_win = x_ref[0, p, :, pl.ds(base + shift, TM)]   # (C_in_p, TM)
            acc = acc + jnp.dot(w_ref[k], x_win,
                                preferred_element_type=jnp.float32)   # MXU, f32 acc
        acc = acc + b_ref[...]                                # f32 bias
        o_ref[0] = jnp.maximum(acc, 0.0).astype(o_ref.dtype)  # f32 ReLU epilogue

    # VMEM budget (double-buffered blocks + headroom); safe on v7x's 64 MiB.
    itemsize_c = jnp.dtype(compute_dtype).itemsize
    block_bytes = (n_phase * C_in_p * Lin * itemsize_c
                   + KH * KW * C_out_p * C_in_p * itemsize_c
                   + C_out_p * 4
                   + C_out_p * TM * 4)
    vmem_limit = int(min(32 * 2**20, max(8 * 2**20, 4 * block_bytes)))

    cost = pl.CostEstimate(
        flops=2 * N * C_out * C_in * KH * KW * Ho * Wo,
        transcendentals=0,
        bytes_accessed=(xp.size * xp.dtype.itemsize
                        + w_taps.size * w_taps.dtype.itemsize
                        + b_col.size * 4
                        + N * C_out_p * M_out * jnp.dtype(out_dtype).itemsize))

    out = pl.pallas_call(
        kernel,
        out_shape=jax.ShapeDtypeStruct((N, C_out_p, M_out), out_dtype),
        grid=(N, n_tiles),
        in_specs=[
            pl.BlockSpec((KH * KW, C_out_p, C_in_p), lambda n, j: (0, 0, 0)),  # weights
            pl.BlockSpec((C_out_p, 1), lambda n, j: (0, 0)),                    # bias
            pl.BlockSpec((1, n_phase, C_in_p, Lin), lambda n, j: (n, 0, 0, 0)), # phases
        ],
        out_specs=pl.BlockSpec((1, C_out_p, TM), lambda n, j: (n, 0, j)),
        compiler_params=pltpu.CompilerParams(
            dimension_semantics=("parallel", "parallel"),
            vmem_limit_bytes=vmem_limit),
        cost_estimate=cost,
    )(w_taps, b_col, xp)

    # Slices + metadata reshape straight to NCHW (no output transpose).
    out = out[:, :C_out, :M].reshape(N, C_out, Hph, Wph)[:, :, :Ho, :Wo]
    return out


if __name__ == "__main__":
    # CBR(in_channels=4, out_channels=8, kernel_size=3): stride=2, padding=2
    N, C_in, H, W = 2, 4, 16, 16
    C_out, K = 8, 3

    key = jax.random.PRNGKey(0)
    kx, kw_, kb = jax.random.split(key, 3)
    x = jax.random.normal(kx, (N, C_in, H, W), dtype=jnp.float32)
    fan_in = C_in * K * K
    weight = jax.random.normal(kw_, (C_out, C_in, K, K), dtype=jnp.float32) / jnp.sqrt(fan_in)
    bias = jax.random.normal(kb, (C_out,), dtype=jnp.float32) * 0.01

    out = cbr_forward(x, weight, bias, stride=2, padding=2)
    out = jax.block_until_ready(out)

    # Reference: same bf16-quantized inputs as the kernel's MXU path, conv with
    # f32 accumulation, bias + ReLU in f32.
    xq = x.astype(jnp.bfloat16).astype(jnp.float32)
    wq = weight.astype(jnp.bfloat16).astype(jnp.float32)
    ref = jax.lax.conv_general_dilated(
        xq, wq, window_strides=(2, 2), padding=((2, 2), (2, 2)),
        dimension_numbers=("NCHW", "OIHW", "NCHW"))
    ref = jnp.maximum(ref + bias[None, :, None, None], 0.0)

    assert out.shape == ref.shape, (out.shape, ref.shape)
    err = float(jnp.max(jnp.abs(out - ref)))
    assert err < 1e-4, err

    print("KERNEL_OK")
</pallas_src>

<mosaic_0001>
module attributes {stable_mosaic.version = 11 : i64} {
  func.func @kernel(%arg0: i32, %arg1: i32, %arg2: memref<9x8x8xbf16, #tpu.memory_space<vmem>>, %arg3: memref<8x1xf32, #tpu.memory_space<vmem>>, %arg4: memref<1x4x8x256xbf16, #tpu.memory_space<vmem>>, %arg5: memref<1x8x128xf32, #tpu.memory_space<vmem>>) attributes {dimension_semantics = [#tpu.dimension_semantics<parallel>, #tpu.dimension_semantics<parallel>], iteration_bounds = array<i64: 2, 1>, scalar_prefetch = 0 : i64, scratch_operands = 0 : i64, tpu.core_type = #tpu.core_type<tc>, window_params = [{pipeline_mode = #tpu.pipeline_mode<synchronous>, transform_indices = @transform_0, window_bounds = array<i64: 9, 8, 8>}, {pipeline_mode = #tpu.pipeline_mode<synchronous>, transform_indices = @transform_1, window_bounds = array<i64: 8, 1>}, {transform_indices = @transform_2, window_bounds = array<i64: 1, 4, 8, 256>}, {transform_indices = @transform_3, window_bounds = array<i64: 1, 8, 128>}]} {
    %cst = arith.constant 0.000000e+00 : f32
    %0 = vector.broadcast %cst : f32 to vector<8x128xf32>
    %c0 = arith.constant 0 : index
    %c0_0 = arith.constant 0 : index
    %c0_1 = arith.constant 0 : index
    %c0_2 = arith.constant 0 : index
    %1 = vector.load %arg4[%c0, %c0_0, %c0_1, %c0_2] : memref<1x4x8x256xbf16, #tpu.memory_space<vmem>>, vector<1x1x8x128xbf16>
    %2 = vector.shape_cast %1 : vector<1x1x8x128xbf16> to vector<8x128xbf16>
    %c0_3 = arith.constant 0 : index
    %c0_4 = arith.constant 0 : index
    %c0_5 = arith.constant 0 : index
    %3 = vector.load %arg2[%c0_3, %c0_4, %c0_5] : memref<9x8x8xbf16, #tpu.memory_space<vmem>>, vector<1x8x8xbf16>
    %4 = vector.shape_cast %3 : vector<1x8x8xbf16> to vector<8x8xbf16>
    %cst_6 = arith.constant dense<0.000000e+00> : vector<8x128xf32>
    %5 = tpu.matmul %4, %2, %cst_6 {dimension_numbers = #tpu.dot_dimension_numbers<[1], [0], [0], [1], [0, 0, 1, 1], [], []>} : vector<8x8xbf16>, vector<8x128xbf16>, vector<8x128xf32> -> vector<8x128xf32>
    %6 = arith.addf %0, %5 : vector<8x128xf32>
    %c0_7 = arith.constant 0 : index
    %c1 = arith.constant 1 : index
    %c0_8 = arith.constant 0 : index
    %c0_9 = arith.constant 0 : index
    %7 = vector.load %arg4[%c0_7, %c1, %c0_8, %c0_9] : memref<1x4x8x256xbf16, #tpu.memory_space<vmem>>, vector<1x1x8x128xbf16>
    %8 = vector.shape_cast %7 : vector<1x1x8x128xbf16> to vector<8x128xbf16>
    %c1_10 = arith.constant 1 : index
    %c0_11 = arith.constant 0 : index
    %c0_12 = arith.constant 0 : index
    %9 = vector.load %arg2[%c1_10, %c0_11, %c0_12] : memref<9x8x8xbf16, #tpu.memory_space<vmem>>, vector<1x8x8xbf16>
    %10 = vector.shape_cast %9 : vector<1x8x8xbf16> to vector<8x8xbf16>
    %cst_13 = arith.constant dense<0.000000e+00> : vector<8x128xf32>
    %11 = tpu.matmul %10, %8, %cst_13 {dimension_numbers = #tpu.dot_dimension_numbers<[1], [0], [0], [1], [0, 0, 1, 1], [], []>} : vector<8x8xbf16>, vector<8x128xbf16>, vector<8x128xf32> -> vector<8x128xf32>
    %12 = arith.addf %6, %11 : vector<8x128xf32>
    %c0_14 = arith.constant 0 : index
    %c0_15 = arith.constant 0 : index
    %c0_16 = arith.constant 0 : index
    %c1_17 = arith.constant 1 : index
    %13 = vector.load %arg4[%c0_14, %c0_15, %c0_16, %c1_17] : memref<1x4x8x256xbf16, #tpu.memory_space<vmem>>, vector<1x1x8x128xbf16>
    %14 = vector.shape_cast %13 : vector<1x1x8x128xbf16> to vector<8x128xbf16>
    %c2 = arith.constant 2 : index
    %c0_18 = arith.constant 0 : index
    %c0_19 = arith.constant 0 : index
    %15 = vector.load %arg2[%c2, %c0_18, %c0_19] : memref<9x8x8xbf16, #tpu.memory_space<vmem>>, vector<1x8x8xbf16>
    %16 = vector.shape_cast %15 : vector<1x8x8xbf16> to vector<8x8xbf16>
    %cst_20 = arith.constant dense<0.000000e+00> : vector<8x128xf32>
    %17 = tpu.matmul %16, %14, %cst_20 {dimension_numbers = #tpu.dot_dimension_numbers<[1], [0], [0], [1], [0, 0, 1, 1], [], []>} : vector<8x8xbf16>, vector<8x128xbf16>, vector<8x128xf32> -> vector<8x128xf32>
    %18 = arith.addf %12, %17 : vector<8x128xf32>
    %c0_21 = arith.constant 0 : index
    %c2_22 = arith.constant 2 : index
    %c0_23 = arith.constant 0 : index
    %c0_24 = arith.constant 0 : index
    %19 = vector.load %arg4[%c0_21, %c2_22, %c0_23, %c0_24] : memref<1x4x8x256xbf16, #tpu.memory_space<vmem>>, vector<1x1x8x128xbf16>
    %20 = vector.shape_cast %19 : vector<1x1x8x128xbf16> to vector<8x128xbf16>
    %c3 = arith.constant 3 : index
    %c0_25 = arith.constant 0 : index
    %c0_26 = arith.constant 0 : index
    %21 = vector.load %arg2[%c3, %c0_25, %c0_26] : memref<9x8x8xbf16, #tpu.memory_space<vmem>>, vector<1x8x8xbf16>
    %22 = vector.shape_cast %21 : vector<1x8x8xbf16> to vector<8x8xbf16>
    %cst_27 = arith.constant dense<0.000000e+00> : vector<8x128xf32>
    %23 = tpu.matmul %22, %20, %cst_27 {dimension_numbers = #tpu.dot_dimension_numbers<[1], [0], [0], [1], [0, 0, 1, 1], [], []>} : vector<8x8xbf16>, vector<8x128xbf16>, vector<8x128xf32> -> vector<8x128xf32>
    %24 = arith.addf %18, %23 : vector<8x128xf32>
    %c0_28 = arith.constant 0 : index
    %c3_29 = arith.constant 3 : index
    %c0_30 = arith.constant 0 : index
    %c0_31 = arith.constant 0 : index
    %25 = vector.load %arg4[%c0_28, %c3_29, %c0_30, %c0_31] : memref<1x4x8x256xbf16, #tpu.memory_space<vmem>>, vector<1x1x8x128xbf16>
    %26 = vector.shape_cast %25 : vector<1x1x8x128xbf16> to vector<8x128xbf16>
    %c4 = arith.constant 4 : index
    %c0_32 = arith.constant 0 : index
    %c0_33 = arith.constant 0 : index
    %27 = vector.load %arg2[%c4, %c0_32, %c0_33] : memref<9x8x8xbf16, #tpu.memory_space<vmem>>, vector<1x8x8xbf16>
    %28 = vector.shape_cast %27 : vector<1x8x8xbf16> to vector<8x8xbf16>
    %cst_34 = arith.constant dense<0.000000e+00> : vector<8x128xf32>
    %29 = tpu.matmul %28, %26, %cst_34 {dimension_numbers = #tpu.dot_dimension_numbers<[1], [0], [0], [1], [0, 0, 1, 1], [], []>} : vector<8x8xbf16>, vector<8x128xbf16>, vector<8x128xf32> -> vector<8x128xf32>
    %30 = arith.addf %24, %29 : vector<8x128xf32>
    %c0_35 = arith.constant 0 : index
    %c2_36 = arith.constant 2 : index
    %c0_37 = arith.constant 0 : index
    %c1_38 = arith.constant 1 : index
    %31 = vector.load %arg4[%c0_35, %c2_36, %c0_37, %c1_38] : memref<1x4x8x256xbf16, #tpu.memory_space<vmem>>, vector<1x1x8x128xbf16>
    %32 = vector.shape_cast %31 : vector<1x1x8x128xbf16> to vector<8x128xbf16>
    %c5 = arith.constant 5 : index
    %c0_39 = arith.constant 0 : index
    %c0_40 = arith.constant 0 : index
    %33 = vector.load %arg2[%c5, %c0_39, %c0_40] : memref<9x8x8xbf16, #tpu.memory_space<vmem>>, vector<1x8x8xbf16>
    %34 = vector.shape_cast %33 : vector<1x8x8xbf16> to vector<8x8xbf16>
    %cst_41 = arith.constant dense<0.000000e+00> : vector<8x128xf32>
    %35 = tpu.matmul %34, %32, %cst_41 {dimension_numbers = #tpu.dot_dimension_numbers<[1], [0], [0], [1], [0, 0, 1, 1], [], []>} : vector<8x8xbf16>, vector<8x128xbf16>, vector<8x128xf32> -> vector<8x128xf32>
    %36 = arith.addf %30, %35 : vector<8x128xf32>
    %c0_42 = arith.constant 0 : index
    %c0_43 = arith.constant 0 : index
    %c0_44 = arith.constant 0 : index
    %c10 = arith.constant 10 : index
    %37 = vector.load %arg4[%c0_42, %c0_43, %c0_44, %c10] : memref<1x4x8x256xbf16, #tpu.memory_space<vmem>>, vector<1x1x8x128xbf16>
    %38 = vector.shape_cast %37 : vector<1x1x8x128xbf16> to vector<8x128xbf16>
    %c6 = arith.constant 6 : index
    %c0_45 = arith.constant 0 : index
    %c0_46 = arith.constant 0 : index
    %39 = vector.load %arg2[%c6, %c0_45, %c0_46] : memref<9x8x8xbf16, #tpu.memory_space<vmem>>, vector<1x8x8xbf16>
    %40 = vector.shape_cast %39 : vector<1x8x8xbf16> to vector<8x8xbf16>
    %cst_47 = arith.constant dense<0.000000e+00> : vector<8x128xf32>
    %41 = tpu.matmul %40, %38, %cst_47 {dimension_numbers = #tpu.dot_dimension_numbers<[1], [0], [0], [1], [0, 0, 1, 1], [], []>} : vector<8x8xbf16>, vector<8x128xbf16>, vector<8x128xf32> -> vector<8x128xf32>
    %42 = arith.addf %36, %41 : vector<8x128xf32>
    %c0_48 = arith.constant 0 : index
    %c1_49 = arith.constant 1 : index
    %c0_50 = arith.constant 0 : index
    %c10_51 = arith.constant 10 : index
    %43 = vector.load %arg4[%c0_48, %c1_49, %c0_50, %c10_51] : memref<1x4x8x256xbf16, #tpu.memory_space<vmem>>, vector<1x1x8x128xbf16>
    %44 = vector.shape_cast %43 : vector<1x1x8x128xbf16> to vector<8x128xbf16>
    %c7 = arith.constant 7 : index
    %c0_52 = arith.constant 0 : index
    %c0_53 = arith.constant 0 : index
    %45 = vector.load %arg2[%c7, %c0_52, %c0_53] : memref<9x8x8xbf16, #tpu.memory_space<vmem>>, vector<1x8x8xbf16>
    %46 = vector.shape_cast %45 : vector<1x8x8xbf16> to vector<8x8xbf16>
    %cst_54 = arith.constant dense<0.000000e+00> : vector<8x128xf32>
    %47 = tpu.matmul %46, %44, %cst_54 {dimension_numbers = #tpu.dot_dimension_numbers<[1], [0], [0], [1], [0, 0, 1, 1], [], []>} : vector<8x8xbf16>, vector<8x128xbf16>, vector<8x128xf32> -> vector<8x128xf32>
    %48 = arith.addf %42, %47 : vector<8x128xf32>
    %c0_55 = arith.constant 0 : index
    %c0_56 = arith.constant 0 : index
    %c0_57 = arith.constant 0 : index
    %c11 = arith.constant 11 : index
    %49 = vector.load %arg4[%c0_55, %c0_56, %c0_57, %c11] : memref<1x4x8x256xbf16, #tpu.memory_space<vmem>>, vector<1x1x8x128xbf16>
    %50 = vector.shape_cast %49 : vector<1x1x8x128xbf16> to vector<8x128xbf16>
    %c8 = arith.constant 8 : index
    %c0_58 = arith.constant 0 : index
    %c0_59 = arith.constant 0 : index
    %51 = vector.load %arg2[%c8, %c0_58, %c0_59] : memref<9x8x8xbf16, #tpu.memory_space<vmem>>, vector<1x8x8xbf16>
    %52 = vector.shape_cast %51 : vector<1x8x8xbf16> to vector<8x8xbf16>
    %cst_60 = arith.constant dense<0.000000e+00> : vector<8x128xf32>
    %53 = tpu.matmul %52, %50, %cst_60 {dimension_numbers = #tpu.dot_dimension_numbers<[1], [0], [0], [1], [0, 0, 1, 1], [], []>} : vector<8x8xbf16>, vector<8x128xbf16>, vector<8x128xf32> -> vector<8x128xf32>
    %54 = arith.addf %48, %53 : vector<8x128xf32>
    %c0_61 = arith.constant 0 : index
    %c0_62 = arith.constant 0 : index
    %55 = vector.load %arg3[%c0_61, %c0_62] : memref<8x1xf32, #tpu.memory_space<vmem>>, vector<8x1xf32>
    %56 = vector.broadcast %55 : vector<8x1xf32> to vector<8x128xf32>
    %57 = arith.addf %54, %56 : vector<8x128xf32>
    %cst_63 = arith.constant 0.000000e+00 : f32
    %58 = vector.broadcast %cst_63 : f32 to vector<8x128xf32>
    %59 = arith.maximumf %57, %58 : vector<8x128xf32>
    %c0_64 = arith.constant 0 : index
    %c0_65 = arith.constant 0 : index
    %c0_66 = arith.constant 0 : index
    %60 = vector.load %arg5[%c0_64, %c0_65, %c0_66] : memref<1x8x128xf32, #tpu.memory_space<vmem>>, vector<1x8x128xf32>
    %61 = vector.shape_cast %60 : vector<1x8x128xf32> to vector<8x128xf32>
    %62 = vector.shape_cast %59 : vector<8x128xf32> to vector<1x8x128xf32>
    tpu.vector_store %arg5[%c0_64, %c0_65, %c0_66], %62 {strides = array<i32>} : memref<1x8x128xf32, #tpu.memory_space<vmem>>, vector<1x8x128xf32>,
    return
  }
  func.func @transform_0(%arg0: i32, %arg1: i32) -> (i32, i32, i32) {
    %c0_i32 = arith.constant 0 : i32
    %c0_i32_0 = arith.constant 0 : i32
    %c0_i32_1 = arith.constant 0 : i32
    %c0_i32_2 = arith.constant 0 : i32
    return %c0_i32, %c0_i32_0, %c0_i32_1 : i32, i32, i32
  }
  func.func @transform_1(%arg0: i32, %arg1: i32) -> (i32, i32) {
    %c0_i32 = arith.constant 0 : i32
    %c0_i32_0 = arith.constant 0 : i32
    %c0_i32_1 = arith.constant 0 : i32
    return %c0_i32, %c0_i32_0 : i32, i32
  }
  func.func @transform_2(%arg0: i32, %arg1: i32) -> (i32, i32, i32, i32) {
    %c0_i32 = arith.constant 0 : i32
    %c0_i32_0 = arith.constant 0 : i32
    %c0_i32_1 = arith.constant 0 : i32
    %c0_i32_2 = arith.constant 0 : i32
    return %arg0, %c0_i32, %c0_i32_0, %c0_i32_1 : i32, i32, i32, i32
  }
  func.func @transform_3(%arg0: i32, %arg1: i32) -> (i32, i32, i32) {
    %c0_i32 = arith.constant 0 : i32
    %c0_i32_0 = arith.constant 0 : i32
    return %arg0, %c0_i32, %arg1 : i32, i32, i32
  }
}

</mosaic_0001>

<bundles_post_ra>
// kernel: tpu_custom_call.1
= control target key start
LH: loop header
LB: loop body
LE: loop exit
PB: predicated region body
PF: predicated region fallthrough
CT: control target
= control target key end

     0   :  { %8 = vsyncpa [#allocation3], 0  ;;  %s884_s0 = inlined_call_operand.vmem [shape: bf16[9,8,8], index: 0, kind: input, shape index: {}]   ;;  %s885_s1 = inlined_call_operand.vmem [shape: f32[8,1], index: 1, kind: input, shape index: {}]   ;;  %s886_s2 = inlined_call_operand.vmem [shape: bf16[2,4,8,256], index: 2, kind: input, shape index: {}]   ;;  %s887_s3 = inlined_call_operand.hbm [shape: f32[2,8,128], index: 3, kind: output, shape index: {}]  }
   0x1   :  { %10 = vsyncpa [#allocation3 + $0x1], 0  ;;  %s728_s12 = smov 0   ;;  %s730_s13 = smov 0  }
   0x2   :  { %s732_s14 = smov 0   ;;  %s734_s15 = smov 0  }
   0x3   :  { %s736_s16 = smov 0   ;;  %s738_s17 = smov 0  }
   0x4 LB: > { %s528_s18 = sadd.s32 4294967295, %s702_s17   ;;  %s529_s19 = sadd.s32 4294967294, %s702_s17   ;;  %s702_s17 = sphi %s738_s17, %s16_s17   ;;  %s698_s16 = sphi %s736_s16, %s894_s16   ;;  %s694_s15 = sphi %s734_s15, %s893_s15   ;;  %s690_s14 = sphi %s732_s14, %s892_s14   ;;  %s686_s13 = sphi %s730_s13, %s891_s13   ;;  %s682_s12 = sphi %s728_s12, %s890_s12  }
   0x5   : > { %s28_s20 = sadd.s32 1, %s698_s16  ;;  %s105_s21 = sadd.s32 1, %s690_s14 }
   0x6   : > { %p30_p0 = scmp.ge.s32.totalorder %s28_s20, 2  ;;  %p115_p1 = scmp.ne.s32.totalorder %s690_s14, %s686_s13 }
   0x7   : > { %p116_p2 = scmp.eq.s32.totalorder %s528_s18, 1  ;;  %p121_p3 = scmp.ne.s32.totalorder %s686_s13, %s682_s12 }
   0x8   : > { %s896_s20 = smov (%p30_p0, %s28_s20), 0  ;;  %p122_p5 = scmp.eq.s32.totalorder %s529_s19, 1 }
   0x9   : > { %p768_p4 = por %p116_p2, %p115_p1  ;;  %s100_s23 = ssub.s32 %s698_s16, %s896_s20 }
   0xa   : > { %p532_p6 = scmp.ge.s32.totalorder %s702_s17, 1  ;;  %p103_p7 = scmp.eq.s32.totalorder %s100_s23, 0 }
   0xb   : > { %p775_p8 = por %p122_p5, %p121_p3  ;;  %p154_p9 = scmp.lt.s32.totalorder %s702_s17, 3 }
   0xc   : > { %s781_s25 = scalar_select %p103_p7, %s690_s14, %s105_s21  }
   0xd   : > { %p155_p10 = pnand %p532_p6, %p154_p9 }
   0xe   : > { %p178_p11 = scmp.lt.s32.totalorder (!%p155_p10), %s694_s15, 1  ;;  %s704_s4 = smov (!%p155_p10), 118  }
   0xf   : > { %158 = sbr.rel (%p155_p10) target bundleno = 318 (0x13e), region = 32  ;;  %s705_s5 = smov (!%p155_p10), 127  }
  0x10   : > { %s706_s6 = smov (!%p155_p10), 117   ;;  %s175_s10 = sand.u32 (!%p155_p10), 1, %s686_s13  }
  0x11   : > { %s533_s11 = sshll.u32 (!%p155_p10), %s175_s10, 3  ;;  %s559_s18 = sshll.u32 (!%p155_p10), %s694_s15, 3 }
  0x12   : > { %s455_s23 = scalar_lea.hbm (!%p155_p10), %s887_s3, %s559_s18 }
  0x13   : > { %s459_s28 = sshll.u32 (!%p155_p10), %s455_s23, 4  ;;  %s460_s28 = int_to_ptr.hbm [resolvable:$true] %s459_s28 }
  0x14   : > { %s179_s26 = scalar_select %p178_p11, %s694_s15, 1  ;;  %vm194_vm0 = vcmask 1043456   ;;  %v537_v17 = vld [vmem:[%s884_s0 + $0x4] sm:$0xf]  ;;  %vm190_vm1 = vcmask 64512   ;;  %vm351_vm2 = vcmask 965632  }
  0x15   : > { %v185_v22 = vld [vmem:[%s884_s0] sm:$0xf]  ;;  %v543_v23 = vld [vmem:[%s884_s0 + $0xc] sm:$0xf]  ;;  %v546_v27 = vld [vmem:[%s884_s0 + $0x10] sm:$0xf] }
  0x16   : > { %s562_s27 = sshll.u32 %s179_s26, 5  ;;  %v554_v31 = vld [vmem:[%s884_s0 + $0x1c] sm:$0xf]  ;;  %v434_v32 = vld [vmem:[%s885_s1] sm:$0xff]  ;;  %v707_v33 = vmov 0   ;;  %vm242_vm3 = vcmask 1039360  }
  0x17   : > { %s788_s30 = scalar_lea.vmem %s886_s2, %s562_s27  ;;  %622 = vset.pattern.permute.xlu1 %v707_v33  ;;  %623 = vset.pattern.permute.xlu0 %v707_v33  ;;  %v540_v42 = vld [vmem:[%s884_s0 + $0x8] sm:$0xf]  ;;  %v549_v47 = vld [vmem:[%s884_s0 + $0x14] sm:$0xf]  ;;  %vm412_vm4 = vcmask 957440   ;;  %s177_s26 = scalar_lea.vmem [#allocation2], %s533_s11 }
  0x18   : > { %v230_v0 = vld [vmem:[%s788_s30] sm:$0xff]  ;;  %v553_v1 = vld [vmem:[%s788_s30 + $0x8] sm:$0xff]  ;;  %v548_v9 = vld [vmem:[%s788_s30 + $0x10] sm:$0xff]  ;;  %s457_s27 = sshll.u32 %s177_s26, 4  ;;  %s444_s15 = scalar_lea.sflag [#allocation3], %s175_s10  ;;  %s458_s27 = int_to_ptr.vmem [resolvable:$true] %s457_s27 }
  0x19   : > { %v234_v2 = vunpack.c.l.b16 %v230_v0  ;;  %v377_v3 = vunpack.c.l.b16 %v553_v1  ;;  %v235_v6 = vunpack.c.h.b16 %v230_v0  ;;  %v378_v7 = vunpack.c.h.b16 %v553_v1  ;;  %v536_v15 = vld [vmem:[%s788_s30 + $0x8] sm:$0xf]  ;;  %v184_v18 = vld [vmem:[%s788_s30] sm:$0xf]  ;;  %v542_v19 = vld [vmem:[%s788_s30 + $0x10] sm:$0xf] }
  0x1a   : > { %v317_v11 = vunpack.c.h.b16 %v548_v9  ;;  %v316_v12 = vunpack.c.l.b16 %v548_v9  ;;  %v196_v16 = vsel %vm194_vm0, %v536_v15, 0  ;;  %v215_v20 = vsel %vm194_vm0, %v184_v18, 0  ;;  %v545_v25 = vld [vmem:[%s788_s30 + $0x18] sm:$0xf]  ;;  %v556_v53 = vld [vmem:[%s884_s0 + $0x20] sm:$0xf] }
  0x1b   : > { %v236_v4 = vpack.c.b16 %v234_v2, %v234_v2  ;;  %v379_v5 = vpack.c.b16 %v377_v3, %v377_v3  ;;  %v237_v8 = vpack.c.b16 %v235_v6, %v235_v6  ;;  %v380_v10 = vpack.c.b16 %v378_v7, %v378_v7  ;;  %205 = vmatpush.bf16.msra.mxu0 %v196_v16  ;;  %v551_v52 = vld [vmem:[%s884_s0 + $0x18] sm:$0xf]  ;;  %s638_s29 = sshra.s32 %s460_s28, 4  ;;  %s639_s29 = int_to_ptr.hbm [resolvable:$true] %s638_s29 }
  0x1c   : > { %v319_v13 = vpack.c.b16 %v317_v11, %v317_v11  ;;  %v318_v14 = vpack.c.b16 %v316_v12, %v316_v12  ;;  %v272_v21 = vsel %vm194_vm0, %v542_v19, 0  ;;  %224 = vmatpush.bf16.msra.mxu1 %v215_v20  ;;  %v296_v26 = vsel %vm194_vm0, %v545_v25, 0  ;;  %s640_s30 = scalar_lea.hbm %s639_s29, 8  ;;  %p645_p1 = scmp.lt.s32.totalorder %s639_s29, %s887_s3 }
  0x1d   : > { %347 = vrot.lane.b32.xlu1 %v236_v4, %s704_s4  ;;  %238 = vrot.lane.b32.xlu0 %v236_v4, %s705_s5  ;;  %p641_p12 = scmp.ne.s32.totalorder %s639_s29, %s640_s30 }
  0x1e   : > { %381 = vrot.lane.b32.xlu2 %v379_v5, %s704_s4  ;;  %538 = vmatmul.msk.bf16.vlgmr.msra.gmra.mxu0 %vm190_vm1, %v537_v17 }
  0x1f   : > { %281 = vmatpush.bf16.msra.mxu3 %v272_v21  ;;  %539 = vmatmul.msk.bf16.vlgmr.msra.gmra.mxu1 %vm190_vm1, %v185_v22  ;;  %p642_p13 = pnand %p641_p12, %p768_p4 }
  0x20   : > { %305 = vmatpush.bf16.msrb.mxu0 %v296_v26 }
  0x21   : > { %p643_p0 = pneg %p642_p13 }
  0x22   : > { %544 = vmatmul.msk.bf16.vlgmr.msra.gmra.mxu3 %vm190_vm1, %v543_v23 }
  0x25   : > { %349 = vrot.lane.b32.xlu1 %v237_v8, %s704_s4  ;;  %240 = vrot.lane.b32.xlu0 %v237_v8, %s705_s5 }
  0x26   : > { %383 = vrot.lane.b32.xlu2 %v380_v10, %s704_s4 }
  0x2d   : > { %322 = vrot.lane.b32.xlu1 %v319_v13, %s705_s5  ;;  %320 = vrot.lane.b32.xlu0 %v318_v14, %s705_s5 }
  0x2e   : > { %408 = vrot.lane.b32.xlu2 %v236_v4, %s706_s6  ;;  %547 = vmatmul.msk.bf16.vlgmr.msrb.gmra.mxu0 %vm190_vm1, %v546_v27 }
  0x35   : > { %410 = vrot.lane.b32.xlu0 %v237_v8, %s706_s6  ;;  %437 = vperm.xlu1 %622, %v434_v32   ;;  %s644_s6 = scalar_lea.hbm %s887_s3, 16 }
  0x36   : > { %p646_p2 = scmp.lt.s32.totalorder %s644_s6, %s640_s30 }
  0x38   : > { %p647_p3 = por %p646_p2, %p645_p1 }
  0x3a   : > { %p648_p5 = pnand %p647_p3, %p643_p0 }
  0x78   : > { %v382_v24 = vpop.permute.xlu2 %381 }
  0x80   : > { %v384_v28 = vpop.permute.xlu2 %383 }
  0x81   : > { %v385_v29 = vsel %vm351_vm2, %v382_v24, %v384_v28 }
  0x82   : > { %v390_v30 = vsel %vm194_vm0, %v385_v29, 0 }
  0x83   : > { %399 = vmatpush.bf16.msrb.mxu3 %v390_v30 }
  0x86   : > { %555 = vmatmul.msk.bf16.vlgmr.msrb.gmra.mxu3 %vm190_vm1, %v554_v31 }
  0x88   : > { %v409_v48 = vpop.permute.xlu2 %408 }
  0x8f   : > { %v348_v34 = vpop.permute.xlu1 %347  ;;  %v239_v35 = vpop.permute.xlu0 %238 }
  0x97   : > { %v350_v36 = vpop.permute.xlu1 %349  ;;  %v241_v37 = vpop.permute.xlu0 %240 }
  0x98   : > { %v243_v38 = vsel %vm242_vm3, %v239_v35, %v241_v37  ;;  %v352_v39 = vsel %vm351_vm2, %v348_v34, %v350_v36 }
  0x99   : > { %v248_v40 = vsel %vm194_vm0, %v243_v38, 0  ;;  %v357_v41 = vsel %vm194_vm0, %v352_v39, 0 }
  0x9a   : > { %257 = vmatpush.bf16.msra.mxu2 %v248_v40 }
  0x9b   : > { %v207_v54 = vpop.f32.mrf.mxu0 }
  0x9c   : > { %v226_v55 = vpop.f32.mrf.mxu1 }
  0x9d   : > { %541 = vmatmul.msk.bf16.vlgmr.msra.gmra.mxu2 %vm190_vm1, %v540_v42  ;;  %v227_v1 = vadd.f32 %v226_v55, %v207_v54 }
  0x9e   : > { %366 = vmatpush.bf16.msrb.mxu2 %v357_v41 }
  0x9f   : > { %v323_v43 = vpop.permute.xlu1 %322  ;;  %v321_v44 = vpop.permute.xlu0 %320 }
  0xa0   : > { %v324_v45 = vsel %vm242_vm3, %v321_v44, %v323_v43 }
  0xa1   : > { %v329_v46 = vsel %vm194_vm0, %v324_v45, 0 }
  0xa2   : > { %338 = vmatpush.bf16.msrb.mxu1 %v329_v46 }
  0xa3   : > { %v209_v56 = vpop.f32.mrf.mxu0 }
  0xa4   : > { %v228_v58 = vpop.f32.mrf.mxu1 }
  0xa5   : > { %550 = vmatmul.msk.bf16.vlgmr.msrb.gmra.mxu1 %vm190_vm1, %v549_v47  ;;  %v283_v57 = vpop.f32.mrf.mxu3 }
  0xa7   : > { %v411_v49 = vpop.permute.xlu0 %410  ;;  %v438_v14 = vpop.permute.xlu1 %437 }
  0xa8   : > { %v413_v50 = vsel %vm412_vm4, %v409_v48, %v411_v49 }
  0xa9   : > { %v418_v51 = vsel %vm194_vm0, %v413_v50, 0 }
  0xaa   : > { %427 = vmatpush.bf16.msra.mxu0 %v418_v51 }
  0xab   : > { %v307_v59 = vpop.f32.mrf.mxu0 }
  0xad   : > { %552 = vmatmul.msk.bf16.vlgmr.msrb.gmra.mxu2 %vm190_vm1, %v551_v52  ;;  %557 = vmatmul.msk.bf16.vlgmr.msra.gmra.mxu0 %vm190_vm1, %v556_v53  ;;  %v285_v60 = vpop.f32.mrf.mxu3 }
  0xb3   : > { %v309_v61 = vpop.f32.mrf.mxu0 }
 0x109   : > { %v401_v62 = vpop.f32.mrf.mxu3 }
 0x111   : > { %v403_v63 = vpop.f32.mrf.mxu3 }
 0x120   : > { %v259_v0 = vpop.f32.mrf.mxu2 }
 0x121   : > { %v263_v3 = vadd.f32 %v259_v0, %v227_v1 }
 0x122   : > { %v340_v2 = vpop.f32.mrf.mxu1 }
 0x123   : > { %v287_v4 = vadd.f32 %v283_v57, %v263_v3 }
 0x125   : > { %v311_v8 = vadd.f32 %v307_v59, %v287_v4 }
 0x127   : > { %v344_v9 = vadd.f32 %v340_v2, %v311_v8 }
 0x128   : > { %v261_v5 = vpop.f32.mrf.mxu2 }
 0x12a   : > { %v429_v6 = vpop.f32.mrf.mxu0  ;;  %v342_v7 = vpop.f32.mrf.mxu1 }
 0x130   : > { %v368_v10 = vpop.f32.mrf.mxu2 }
 0x131   : > { %v372_v11 = vadd.f32 %v368_v10, %v344_v9 }
 0x132   : > { %v431_v12 = vpop.f32.mrf.mxu0 }
 0x133   : > { %v405_v13 = vadd.f32 %v401_v62, %v372_v11 }
 0x135   : > { %v433_v15 = vadd.f32 %v429_v6, %v405_v13 }
 0x137   : > { %v440_v16 = vadd.f32 %v438_v14, %v433_v15 }
 0x138   : > { %v370_v17 = vpop.f32.mrf.mxu2 }
 0x139   : > { %v441_v18 = vmax.f32 %v440_v16, 0.0 }
 0x13b   : > { %442 = vst [vmem:[%s177_s26] sm:$0xff] %v441_v18 }
 0x13c   : > { %651 = shalt.err (!%p648_p5)
}
 0x13d   : > { %563 = dma.vmem_to_hbm [thread:$0]  (%p768_p4), %s458_s27, 128, %s460_s28, %s444_s15  }
 0x13e PF: > { %p569_p6 = scmp.ge.s32.totalorder %s702_s17, 2  ;;  %s471_s9 = sand.u32 1, %s682_s12  }
 0x13f   : > { %s472_s10 = scalar_lea.sflag [#allocation3], %s471_s9 }
 0x140   : > { %p566_p7 = pnand %p569_p6, %p775_p8 }
 0x142   : > { %p567_p9 = pneg %p566_p7 }
 0x144   : > { %677 = dma.done.wait (%p567_p9), %s472_s10, 128  }
 0x145   : > { %679 = vsyncadd (%p567_p9), %s472_s10, 4294967168  ;;  %s16_s17 = sadd.s32 1, %s702_s17   ;;  %s890_s12 = smov %s686_s13 }
 0x146   : > { %p13_p10 = scmp.ge.s32.totalorder %s16_s17, 4   ;;  %s891_s13 = smov %s690_s14 }
 0x147   : > { %s892_s14 = smov %s781_s25  ;;  %s893_s15 = smov %s698_s16 }
 0x148   : > { %s894_s16 = smov %s896_s20  ;;  %15 = sbr.rel (!%p13_p10) target bundleno = 4 (0x4), region = 78 }
 0x14d   :  { %478 = vsyncpa [#allocation3], 1 }
 0x14e   :  { %480 = vsyncpa [#allocation3 + $0x1], 1 }

</bundles_post_ra>
